<compile_context>
chip_gen: v6e
topology: v6e:2x2x1
jax: 0.10.0
libtpu: 0.0.40
codegen_flags: <defaults>
</compile_context>

<pallas_src>
import functools

import numpy as np
import jax
import jax.numpy as jnp
from jax.experimental import pallas as pl
from jax.experimental.pallas import tpu as pltpu

IGNORE_INDEX = -100   # CrossEntropyLoss default ignore_index (padding labels)


# --------------------------------------------------------------------------
# Constant reversal matrices (cached device buffers, never rebuilt per call).
# --------------------------------------------------------------------------
@functools.lru_cache(maxsize=None)
def _reversal_matrices(s):
    rev_sub = np.ascontiguousarray(np.eye(s, dtype=np.float32)[::-1])      # (S, S)
    rev_lane = np.ascontiguousarray(np.eye(128, dtype=np.float32)[::-1])   # (128, 128)
    return jnp.asarray(rev_sub), jnp.asarray(rev_lane)


@functools.lru_cache(maxsize=None)
def _bf16_exp_supported():
    # bf16 EUP exists on v6e / v7x; v5e (and older) keep the f32 exp path.
    kind = jax.devices()[0].device_kind.lower()
    return ("v6" in kind) or ("v7" in kind) or ("7x" in kind)


# --------------------------------------------------------------------------
# Kernel A: exact 180-degree rotation of each (H, W) slice.
#   Each (b, c) slice is presented as (S, 128), S = H*W/128.  rotate180 ==
#   full reversal of the flattened H*W vector == reverse the 128 lanes
#   (right-multiply by a (128,128) reversal) AND reverse the S sublane rows
#   (left-multiply by an (S,S) reversal).  Grid over the B*C slices
#   ("parallel" -> both TensorCores on v7x); constant matrices are fetched
#   once (constant index_map).  Normalization is folded downstream.
# --------------------------------------------------------------------------
def _rotate180_kernel(x_ref, rev_sub_ref, rev_lane_ref, o_ref):
    y = jnp.dot(x_ref[...], rev_lane_ref[...],
                preferred_element_type=jnp.float32)          # lane flip
    o_ref[...] = jnp.dot(rev_sub_ref[...], y,
                         preferred_element_type=jnp.float32)  # sublane flip


def rotate180(x):
    """Exact 180-degree rotation of each (H, W) slice of a (B, C, H, W) tensor."""
    B, C, H, W = x.shape
    assert (H * W) % 128 == 0, "H*W must be a multiple of 128 for the lane-dense layout"
    S = (H * W) // 128
    assert S % 8 == 0, "H*W/128 must be a multiple of 8 (sublane tiling)"
    x2 = x.reshape(B * C * S, 128).astype(jnp.float32)
    rev_sub, rev_lane = _reversal_matrices(S)

    out = pl.pallas_call(
        _rotate180_kernel,
        out_shape=jax.ShapeDtypeStruct((B * C * S, 128), jnp.float32),
        grid=(B * C,),
        in_specs=[
            pl.BlockSpec((S, 128), lambda i: (i, 0)),        # one slice per step
            pl.BlockSpec((S, S), lambda i: (0, 0)),          # constant (fetched once)
            pl.BlockSpec((128, 128), lambda i: (0, 0)),      # constant (fetched once)
        ],
        out_specs=pl.BlockSpec((S, 128), lambda i: (i, 0)),
        compiler_params=pltpu.CompilerParams(
            dimension_semantics=("parallel",)),              # slices are independent
    )(x2, rev_sub, rev_lane)
    return out.reshape(B, C, H, W)


# --------------------------------------------------------------------------
# Kernel B: token-level cross entropy with ignore_index = -100 (the HF
# VisionEncoderDecoderModel loss).  Tiled over row blocks; running
# (total, count) in SMEM scratch; fused single pass over `shifted`;
# bf16 exp on v6e/v7x; scalar result in a (1, 1) SMEM output.
# --------------------------------------------------------------------------
def _make_cross_entropy_kernel(use_bf16_exp):
    def kernel(logits_ref, labels_ref, loss_ref, acc_ref):
        step = pl.program_id(0)

        @pl.when(step == 0)
        def _init():
            acc_ref[0] = 0.0      # running sum of per-token losses
            acc_ref[1] = 0.0      # running count of non-ignored tokens

        logits = logits_ref[...]                              # (TN, V) f32
        labels = labels_ref[...]                              # (TN, 1) int32

        row_max = jnp.max(logits, axis=1, keepdims=True)
        shifted = logits - row_max                            # computed once, reused
        if use_bf16_exp:
            # bf16 exp on the EUP (binding unit); accumulate in f32.
            exps = jnp.exp(shifted.astype(jnp.bfloat16)).astype(jnp.float32)
        else:
            exps = jnp.exp(shifted)
        sum_exp = jnp.sum(exps, axis=1, keepdims=True)        # (TN, 1)

        vocab_iota = jax.lax.broadcasted_iota(jnp.int32, shifted.shape, 1)
        picked_shifted = jnp.sum(
            jnp.where(vocab_iota == labels, shifted, 0.0),
            axis=1, keepdims=True)                            # shifted logit at label id

        valid = (labels >= 0).astype(jnp.float32)             # -100 -> ignored
        loss_rows = (jnp.log(sum_exp) - picked_shifted) * valid

        acc_ref[0] += jnp.sum(loss_rows)
        acc_ref[1] += jnp.sum(valid)

        @pl.when(step == pl.num_programs(0) - 1)
        def _finalize():
            # NOTE: if every label is ignored, count == 0 -> NaN, matching
            # torch.nn.CrossEntropyLoss(reduction='mean').
            loss_ref[0, 0] = acc_ref[0] / acc_ref[1]

    return kernel


def cross_entropy_loss(logits, labels, *, block_rows=None):
    """logits: (B, L, V) f32, labels: (B, L) int32 with -100 = ignore -> scalar loss."""
    B, L, V = logits.shape
    N = B * L
    logits2 = logits.reshape(N, V).astype(jnp.float32)
    labels2 = labels.reshape(N, 1).astype(jnp.int32)

    if block_rows is None:
        block_rows = 64 if N % 64 == 0 else N     # toy scale: 2 steps exercise the carry
    assert N % block_rows == 0 and block_rows % 8 == 0
    n_blocks = N // block_rows

    out = pl.pallas_call(
        _make_cross_entropy_kernel(_bf16_exp_supported()),
        out_shape=jax.ShapeDtypeStruct((1, 1), jnp.float32),
        grid=(n_blocks,),
        in_specs=[
            pl.BlockSpec((block_rows, V), lambda i: (i, 0)),
            pl.BlockSpec((block_rows, 1), lambda i: (i, 0)),
        ],
        out_specs=pl.BlockSpec((1, 1), lambda i: (0, 0),
                               memory_space=pltpu.MemorySpace.SMEM),
        scratch_shapes=[pltpu.SMEM((2,), jnp.float32)],
        compiler_params=pltpu.CompilerParams(
            # Row axis carries the scratch accumulator -> "arbitrary".  At real
            # TrOCR scale (V=50265) keep bf16 row blocks and, on v7x, switch to
            # per-block partial outputs with a "parallel" axis for 2 TCs.
            dimension_semantics=("arbitrary",)),
    )(logits2, labels2)
    return out[0, 0]


# --------------------------------------------------------------------------
# Full TrOCRLoss forward.
# --------------------------------------------------------------------------
def trocr_loss_forward(x, labels, params_key, *, rotate=False, vocab_size=512,
                       hidden=64):
    """Forward pass of TrOCRLoss.

    `rotate` is the module's ctor arg (self.flip).  The two rotate-180
    transforms commute with the elementwise normalization, so:
      rotate=True  -> pixel_values = 2x - 1            (no net rotation)
      rotate=False -> pixel_values = 2*rotate180(x) - 1
    The affine (scale 2, offset -1) is folded into the first downstream weight
    matrix, so only the rotation (when present) runs as a Pallas kernel.
    """
    B, C, H, W = x.shape
    L = labels.shape[1]

    if rotate:
        pixel_rot = x.astype(jnp.float32)      # rotations cancel; affine folded below
    else:
        pixel_rot = rotate180(x)               # Pallas kernel (pure rotation)

    # TODO(synk): the pretrained TrOCR VisionEncoderDecoderModel
    # ('microsoft/trocr-base-stage1': ViT encoder + transformer decoder with
    # cross-attention) has no Pallas equivalent here; it is replaced by a small
    # fixed-random projection producing decoder logits of the correct
    # (B, L, vocab) shape so the surrounding math (rotation, folded
    # normalization, CE loss) stays exact and data-dependent.
    k1, k2 = jax.random.split(params_key)
    w1 = jax.random.normal(k1, (C * H * W, hidden), jnp.float32) / np.sqrt(C * H * W)
    w2 = jax.random.normal(k2, (hidden, L * vocab_size), jnp.float32) / np.sqrt(hidden)
    w1_eff = 2.0 * w1                      # fold the 1/0.5 scale of diff_norm
    b1_eff = -jnp.sum(w1, axis=0)          # fold the -0.5/0.5 offset of diff_norm
    feat = pixel_rot.reshape(B, C * H * W)
    logits = (jnp.tanh(feat @ w1_eff + b1_eff) @ w2).reshape(B, L, vocab_size)

    return cross_entropy_loss(logits, labels)


if __name__ == "__main__":
    key = jax.random.PRNGKey(0)
    k_img, k_model = jax.random.split(key)

    B, C, H, W = 2, 3, 32, 32      # RGB images (TrOCR takes 3-channel input)
    L, V = 64, 512                 # labels max_length=64 as in the module; small vocab

    x = jax.random.uniform(k_img, (B, C, H, W), jnp.float32)

    # TODO(synk): labels come from TrOCRProcessor's tokenizer in the reference;
    # here: deterministic token ids with padded positions replaced by -100,
    # shared across the batch (matching labels.expand(batch_size, -1)).
    pos = jnp.arange(L)
    label_row = jnp.where(pos < 23, (pos * 37 + 11) % V, IGNORE_INDEX)
    labels = jnp.broadcast_to(label_row, (B, L)).astype(jnp.int32)

    fwd = jax.jit(trocr_loss_forward,
                  static_argnames=("rotate", "vocab_size", "hidden"))

    # Default module config: rotate=False -> single 180-degree rotation path.
    loss = fwd(x, labels, k_model, rotate=False, vocab_size=V)
    loss = jax.block_until_ready(loss)
    assert loss.shape == () and bool(jnp.isfinite(loss))

    # Also exercise the rotate=True (no net rotation, no preprocess kernel) path.
    loss_rot = fwd(x, labels, k_model, rotate=True, vocab_size=V)
    loss_rot = jax.block_until_ready(loss_rot)
    assert bool(jnp.isfinite(loss_rot))

    print("KERNEL_OK")
</pallas_src>

<mosaic_0001>
module attributes {stable_mosaic.version = 11 : i64} {
  func.func @_rotate180_kernel(%arg0: i32, %arg1: memref<8x128xf32, #tpu.memory_space<vmem>>, %arg2: memref<8x8xf32, #tpu.memory_space<vmem>>, %arg3: memref<128x128xf32, #tpu.memory_space<vmem>>, %arg4: memref<8x128xf32, #tpu.memory_space<vmem>>) attributes {dimension_semantics = [#tpu.dimension_semantics<parallel>], iteration_bounds = array<i64: 6>, scalar_prefetch = 0 : i64, scratch_operands = 0 : i64, tpu.core_type = #tpu.core_type<tc>, window_params = [{transform_indices = @transform_0, window_bounds = array<i64: 8, 128>}, {pipeline_mode = #tpu.pipeline_mode<synchronous>, transform_indices = @transform_1, window_bounds = array<i64: 8, 8>}, {pipeline_mode = #tpu.pipeline_mode<synchronous>, transform_indices = @transform_2, window_bounds = array<i64: 128, 128>}, {transform_indices = @transform_3, window_bounds = array<i64: 8, 128>}]} {
    %c0 = arith.constant 0 : index
    %c0_0 = arith.constant 0 : index
    %0 = vector.load %arg1[%c0, %c0_0] : memref<8x128xf32, #tpu.memory_space<vmem>>, vector<8x128xf32>
    %c0_1 = arith.constant 0 : index
    %c0_2 = arith.constant 0 : index
    %1 = vector.load %arg3[%c0_1, %c0_2] : memref<128x128xf32, #tpu.memory_space<vmem>>, vector<128x128xf32>
    %cst = arith.constant dense<0.000000e+00> : vector<8x128xf32>
    %2 = tpu.matmul %0, %1, %cst {dimension_numbers = #tpu.dot_dimension_numbers<[1], [0], [0], [1], [0, 0, 1, 1], [], []>} : vector<8x128xf32>, vector<128x128xf32>, vector<8x128xf32> -> vector<8x128xf32>
    %c0_3 = arith.constant 0 : index
    %c0_4 = arith.constant 0 : index
    %3 = vector.load %arg2[%c0_3, %c0_4] : memref<8x8xf32, #tpu.memory_space<vmem>>, vector<8x8xf32>
    %cst_5 = arith.constant dense<0.000000e+00> : vector<8x128xf32>
    %4 = tpu.matmul %3, %2, %cst_5 {dimension_numbers = #tpu.dot_dimension_numbers<[1], [0], [0], [1], [0, 0, 1, 1], [], []>} : vector<8x8xf32>, vector<8x128xf32>, vector<8x128xf32> -> vector<8x128xf32>
    %c0_6 = arith.constant 0 : index
    %c0_7 = arith.constant 0 : index
    %5 = vector.load %arg4[%c0_6, %c0_7] : memref<8x128xf32, #tpu.memory_space<vmem>>, vector<8x128xf32>
    tpu.vector_store %arg4[%c0_6, %c0_7], %4 {strides = array<i32>} : memref<8x128xf32, #tpu.memory_space<vmem>>, vector<8x128xf32>,
    return
  }
  func.func @transform_0(%arg0: i32) -> (i32, i32) {
    %c0_i32 = arith.constant 0 : i32
    %c0_i32_0 = arith.constant 0 : i32
    return %arg0, %c0_i32 : i32, i32
  }
  func.func @transform_1(%arg0: i32) -> (i32, i32) {
    %c0_i32 = arith.constant 0 : i32
    %c0_i32_0 = arith.constant 0 : i32
    %c0_i32_1 = arith.constant 0 : i32
    return %c0_i32, %c0_i32_0 : i32, i32
  }
  func.func @transform_2(%arg0: i32) -> (i32, i32) {
    %c0_i32 = arith.constant 0 : i32
    %c0_i32_0 = arith.constant 0 : i32
    %c0_i32_1 = arith.constant 0 : i32
    return %c0_i32, %c0_i32_0 : i32, i32
  }
  func.func @transform_3(%arg0: i32) -> (i32, i32) {
    %c0_i32 = arith.constant 0 : i32
    %c0_i32_0 = arith.constant 0 : i32
    return %arg0, %c0_i32 : i32, i32
  }
}

module attributes {stable_mosaic.version = 11 : i64} {
  func.func @kernel(%arg0: i32, %arg1: memref<64x512xf32, #tpu.memory_space<vmem>>, %arg2: memref<64x1xi32, #tpu.memory_space<vmem>>, %arg3: memref<1x1xf32, #tpu.memory_space<smem>>, %arg4: memref<2xf32, #tpu.memory_space<smem>>) attributes {dimension_semantics = [#tpu.dimension_semantics<arbitrary>], iteration_bounds = array<i64: 2>, scalar_prefetch = 0 : i64, scratch_operands = 1 : i64, tpu.core_type = #tpu.core_type<tc>, window_params = [{transform_indices = @transform_0, window_bounds = array<i64: 64, 512>}, {transform_indices = @transform_1, window_bounds = array<i64: 64, 1>}, {transform_indices = @transform_2, window_bounds = array<i64: 1, 1>}]} {
    %c0_i32 = arith.constant 0 : i32
    %0 = arith.cmpi eq, %arg0, %c0_i32 : i32
    %1 = arith.extui %0 : i1 to i32
    %c0_i32_0 = arith.constant 0 : i32
    %2 = arith.cmpi ne, %1, %c0_i32_0 : i32
    scf.if %2 {
      %cst_14 = arith.constant 0.000000e+00 : f32
      %c0_15 = arith.constant 0 : index
      %43 = memref.load %arg4[%c0_15] : memref<2xf32, #tpu.memory_space<smem>>
      memref.store %cst_14, %arg4[%c0_15] : memref<2xf32, #tpu.memory_space<smem>>
      %cst_16 = arith.constant 0.000000e+00 : f32
      %c1_17 = arith.constant 1 : index
      %44 = memref.load %arg4[%c1_17] : memref<2xf32, #tpu.memory_space<smem>>
      memref.store %cst_16, %arg4[%c1_17] : memref<2xf32, #tpu.memory_space<smem>>
    } else {
    }
    %c0 = arith.constant 0 : index
    %c0_1 = arith.constant 0 : index
    %3 = vector.load %arg1[%c0, %c0_1] : memref<64x512xf32, #tpu.memory_space<vmem>>, vector<64x512xf32>
    %c0_2 = arith.constant 0 : index
    %c0_3 = arith.constant 0 : index
    %4 = vector.load %arg2[%c0_2, %c0_3] : memref<64x1xi32, #tpu.memory_space<vmem>>, vector<64x1xi32>
    %cst = arith.constant dense<0xFF800000> : vector<64xf32>
    %5 = vector.multi_reduction <maximumf>, %3, %cst [1] : vector<64x512xf32> to vector<64xf32>
    %6 = vector.shape_cast %5 : vector<64xf32> to vector<64x1xf32>
    %7 = vector.broadcast %6 : vector<64x1xf32> to vector<64x512xf32>
    %8 = arith.subf %3, %7 : vector<64x512xf32>
    %9 = math.exp %8 : vector<64x512xf32>
    %cst_4 = arith.constant dense<0.000000e+00> : vector<64xf32>
    %10 = vector.multi_reduction <add>, %9, %cst_4 [1] : vector<64x512xf32> to vector<64xf32>
    %11 = vector.shape_cast %10 : vector<64xf32> to vector<64x1xf32>
    %12 = tpu.iota {dimensions = array<i32: 1>} : vector<64x512xi32>
    %13 = vector.broadcast %4 : vector<64x1xi32> to vector<64x512xi32>
    %14 = arith.cmpi eq, %12, %13 : vector<64x512xi32>
    %cst_5 = arith.constant 0.000000e+00 : f32
    %15 = vector.broadcast %cst_5 : f32 to vector<64x512xf32>
    %16 = arith.select %14, %8, %15 : vector<64x512xi1>, vector<64x512xf32>
    %cst_6 = arith.constant dense<0.000000e+00> : vector<64xf32>
    %17 = vector.multi_reduction <add>, %16, %cst_6 [1] : vector<64x512xf32> to vector<64xf32>
    %18 = vector.shape_cast %17 : vector<64xf32> to vector<64x1xf32>
    %c0_i32_7 = arith.constant 0 : i32
    %19 = vector.broadcast %c0_i32_7 : i32 to vector<64x1xi32>
    %20 = arith.cmpi sge, %4, %19 : vector<64x1xi32>
    %21 = arith.extui %20 : vector<64x1xi1> to vector<64x1xi32>
    %22 = arith.sitofp %21 : vector<64x1xi32> to vector<64x1xf32>
    %23 = math.log %11 : vector<64x1xf32>
    %24 = arith.subf %23, %18 : vector<64x1xf32>
    %25 = arith.mulf %24, %22 : vector<64x1xf32>
    %c0_8 = arith.constant 0 : index
    %26 = memref.load %arg4[%c0_8] : memref<2xf32, #tpu.memory_space<smem>>
    %27 = vector.shape_cast %25 : vector<64x1xf32> to vector<1x64x1xf32>
    %cst_9 = arith.constant dense<0.000000e+00> : vector<1xf32>
    %28 = vector.multi_reduction <add>, %27, %cst_9 [1, 2] : vector<1x64x1xf32> to vector<1xf32>
    %29 = vector.shape_cast %28 : vector<1xf32> to vector<1x1x1xf32>
    %30 = vector.extract %29[0, 0, 0] : f32 from vector<1x1x1xf32>
    %31 = arith.addf %26, %30 : f32
    %c0_10 = arith.constant 0 : index
    %32 = memref.load %arg4[%c0_10] : memref<2xf32, #tpu.memory_space<smem>>
    memref.store %31, %arg4[%c0_10] : memref<2xf32, #tpu.memory_space<smem>>
    %c1 = arith.constant 1 : index
    %33 = memref.load %arg4[%c1] : memref<2xf32, #tpu.memory_space<smem>>
    %34 = vector.shape_cast %22 : vector<64x1xf32> to vector<1x64x1xf32>
    %cst_11 = arith.constant dense<0.000000e+00> : vector<1xf32>
    %35 = vector.multi_reduction <add>, %34, %cst_11 [1, 2] : vector<1x64x1xf32> to vector<1xf32>
    %36 = vector.shape_cast %35 : vector<1xf32> to vector<1x1x1xf32>
    %37 = vector.extract %36[0, 0, 0] : f32 from vector<1x1x1xf32>
    %38 = arith.addf %33, %37 : f32
    %c1_12 = arith.constant 1 : index
    %39 = memref.load %arg4[%c1_12] : memref<2xf32, #tpu.memory_space<smem>>
    memref.store %38, %arg4[%c1_12] : memref<2xf32, #tpu.memory_space<smem>>
    %c1_i32 = arith.constant 1 : i32
    %40 = arith.cmpi eq, %arg0, %c1_i32 : i32
    %41 = arith.extui %40 : i1 to i32
    %c0_i32_13 = arith.constant 0 : i32
    %42 = arith.cmpi ne, %41, %c0_i32_13 : i32
    scf.if %42 {
      %c0_14 = arith.constant 0 : index
      %43 = memref.load %arg4[%c0_14] : memref<2xf32, #tpu.memory_space<smem>>
      %c1_15 = arith.constant 1 : index
      %44 = memref.load %arg4[%c1_15] : memref<2xf32, #tpu.memory_space<smem>>
      %45 = arith.divf %43, %44 : f32
      %c0_16 = arith.constant 0 : index
      %c0_17 = arith.constant 0 : index
      %46 = memref.load %arg3[%c0_16, %c0_17] : memref<1x1xf32, #tpu.memory_space<smem>>
      memref.store %45, %arg3[%c0_16, %c0_17] : memref<1x1xf32, #tpu.memory_space<smem>>
    } else {
    }
    return
  }
  func.func @transform_0(%arg0: i32) -> (i32, i32) {
    %c0_i32 = arith.constant 0 : i32
    %c0_i32_0 = arith.constant 0 : i32
    return %arg0, %c0_i32 : i32, i32
  }
  func.func @transform_1(%arg0: i32) -> (i32, i32) {
    %c0_i32 = arith.constant 0 : i32
    %c0_i32_0 = arith.constant 0 : i32
    return %arg0, %c0_i32 : i32, i32
  }
  func.func @transform_2(%arg0: i32) -> (i32, i32) {
    %c0_i32 = arith.constant 0 : i32
    %c0_i32_0 = arith.constant 0 : i32
    %c0_i32_1 = arith.constant 0 : i32
    return %c0_i32, %c0_i32_0 : i32, i32
  }
}

</mosaic_0001>

<bundles_post_ra>
// kernel: neg.4
= control target key start
LH: loop header
LB: loop body
LE: loop exit
PB: predicated region body
PF: predicated region fallthrough
CT: control target
= control target key end

     0   :  { %s24_s0 = inlined_call_operand.vmem [shape: f32[64], index: 0, kind: input, shape index: {}]   ;;  %s25_s1 = inlined_call_operand.vmem [shape: f32[64], index: 1, kind: output, shape index: {}]  }
   0x1   :  { %v2_v0 = vld [vmem:[%s24_s0] sm:$0x1] }
   0x2   :  { %v5_v1 = vxor.u32 2147483648, %v2_v0 }
   0x4   :  { %7 = vst [vmem:[%s25_s1] sm:$0x1] %v5_v1 }

// kernel: trocr_loss_forward.4
= control target key start
LH: loop header
LB: loop body
LE: loop exit
PB: predicated region body
PF: predicated region fallthrough
CT: control target
= control target key end

     0   :  { %s491_s12 = smov 0   ;;  %s566_s0 = inlined_call_operand.vmem [shape: f32[48,128], index: 0, kind: input, shape index: {}]   ;;  %s567_s1 = inlined_call_operand.vmem [shape: f32[8,8], index: 1, kind: input, shape index: {}]   ;;  %s568_s2 = inlined_call_operand.vmem [shape: f32[128,128], index: 2, kind: input, shape index: {}]   ;;  %s569_s3 = inlined_call_operand.vmem [shape: f32[48,128], index: 3, kind: output, shape index: {}]  }
   0x1 LB: > { %s382_s13 = sadd.s32 4294967295, %s467_s12   ;;  %p386_p0 = scmp.ge.s32.totalorder %s467_s12, 1  ;;  %s467_s12 = sphi %s491_s12, %s13_s12  }
   0x2   : > { %p136_p1 = scmp.lt.s32.totalorder %s467_s12, 7 }
   0x4   : > { %p137_p2 = pnand %p386_p0, %p136_p1 }
   0x5   : > { %p158_p3 = scmp.lt.s32.totalorder (!%p137_p2), %s382_s13, 5 }
   0x6   : > { %140 = sbr.rel (%p137_p2) target bundleno = 433 (0x1b1), region = 32 }
   0xb   : > { %v182_v0 = vld [vmem:[%s568_s2 + $0x78] sm:$0xff]  ;;  %v469_v1 = vmov 0.0   ;;  %v181_v2 = vld [vmem:[%s568_s2 + $0x70] sm:$0xff]  ;;  %vm470_vm0 = vmmov 0   ;;  %v180_v3 = vld [vmem:[%s568_s2 + $0x68] sm:$0xff]  ;;  %s571_s13 = smov (!%p158_p3, %s382_s13), 5 }
   0xc   : > { %411 = vmatprep.subr.mxu0 %v469_v1  ;;  %443 = vmatprep.mubr.msk.f32.mxu0 %vm470_vm0, %v469_v1  ;;  %v179_v4 = vld [vmem:[%s568_s2 + $0x60] sm:$0xff]  ;;  %v178_v5 = vld [vmem:[%s568_s2 + $0x58] sm:$0xff]  ;;  %v177_v6 = vld [vmem:[%s568_s2 + $0x50] sm:$0xff]  ;;  %s387_s15 = sshll.u32 %s571_s13, 3  ;;  %vm254_vm1 = vcmask 64512  }
   0xd   : > { %412 = vmatpush3.msra.mxu0 %v182_v0  ;;  %446 = vmatprep.subr.mxu1 %v469_v1  ;;  %v176_v7 = vld [vmem:[%s568_s2 + $0x48] sm:$0xff]  ;;  %v175_v8 = vld [vmem:[%s568_s2 + $0x40] sm:$0xff]  ;;  %v174_v9 = vld [vmem:[%s568_s2 + $0x38] sm:$0xff]  ;;  %s161_s22 = scalar_lea.vmem %s566_s0, %s387_s15  ;;  %s165_s28 = scalar_lea.vmem %s569_s3, %s387_s15 }
   0xe   : > { %413 = vmatprep.subr.mxu0 %v469_v1  ;;  %448 = vmatprep.mubr.msk.f32.mxu1 %vm470_vm0, %v469_v1  ;;  %v173_v10 = vld [vmem:[%s568_s2 + $0x30] sm:$0xff]  ;;  %v172_v11 = vld [vmem:[%s568_s2 + $0x28] sm:$0xff]  ;;  %v171_v12 = vld [vmem:[%s568_s2 + $0x20] sm:$0xff] }
   0xf   : > { %414 = vmatpush3.msra.mxu0 %v181_v2  ;;  %v170_v13 = vld [vmem:[%s568_s2 + $0x18] sm:$0xff]  ;;  %v169_v14 = vld [vmem:[%s568_s2 + $0x10] sm:$0xff]  ;;  %v168_v15 = vld [vmem:[%s568_s2 + $0x8] sm:$0xff] }
  0x10   : > { %415 = vmatprep.subr.mxu0 %v469_v1  ;;  %v167_v16 = vld [vmem:[%s568_s2] sm:$0xff] }
  0x11   : > { %416 = vmatpush3.msra.mxu0 %v180_v3  ;;  %v166_v17 = vld [vmem:[%s161_s22] sm:$0xff] }
  0x12   : > { %417 = vmatprep.subr.mxu0 %v469_v1  ;;  %v253_v18 = vld [vmem:[%s567_s1] sm:$0xff] }
  0x13   : > { %418 = vmatpush3.msra.mxu0 %v179_v4 }
  0x14   : > { %419 = vmatprep.subr.mxu0 %v469_v1 }
  0x15   : > { %420 = vmatpush3.msra.mxu0 %v178_v5 }
  0x16   : > { %421 = vmatprep.subr.mxu0 %v469_v1 }
  0x17   : > { %422 = vmatpush3.msra.mxu0 %v177_v6 }
  0x18   : > { %423 = vmatprep.subr.mxu0 %v469_v1 }
  0x19   : > { %424 = vmatpush3.msra.mxu0 %v176_v7 }
  0x1a   : > { %425 = vmatprep.subr.mxu0 %v469_v1 }
  0x1b   : > { %426 = vmatpush3.msra.mxu0 %v175_v8 }
  0x1c   : > { %427 = vmatprep.subr.mxu0 %v469_v1 }
  0x1d   : > { %428 = vmatpush3.msra.mxu0 %v174_v9 }
  0x1e   : > { %429 = vmatprep.subr.mxu0 %v469_v1 }
  0x1f   : > { %430 = vmatpush3.msra.mxu0 %v173_v10 }
  0x20   : > { %431 = vmatprep.subr.mxu0 %v469_v1 }
  0x21   : > { %432 = vmatpush3.msra.mxu0 %v172_v11 }
  0x22   : > { %433 = vmatprep.subr.mxu0 %v469_v1 }
  0x23   : > { %434 = vmatpush3.msra.mxu0 %v171_v12 }
  0x24   : > { %435 = vmatprep.subr.mxu0 %v469_v1 }
  0x25   : > { %436 = vmatpush3.msra.mxu0 %v170_v13 }
  0x26   : > { %437 = vmatprep.subr.mxu0 %v469_v1 }
  0x27   : > { %438 = vmatpush3.msra.mxu0 %v169_v14 }
  0x28   : > { %439 = vmatprep.subr.mxu0 %v469_v1 }
  0x29   : > { %440 = vmatpush3.msra.mxu0 %v168_v15 }
  0x2a   : > { %441 = vmatprep.subr.mxu0 %v469_v1 }
  0x2b   : > { %442 = vmatpush3.msra.mxu0 %v167_v16 }
  0x2c   : > { %444 = vmatmul.mubr.f32.vlgmr.msra.gmra.mxu0 %v166_v17 }
  0xec   : > { %v249_v19 = vpop.f32.mrf.mxu0 }
  0xed   : > { %447 = vmatpush3.msra.mxu1 %v249_v19 }
  0xee   : > { %v445_v20 = vpop.f32.mrf.mxu0  ;;  %449 = vmatmul.mubr.msk.f32.vlgmr.msra.gmra.mxu1 %vm254_vm1, %v253_v18 }
 0x1ae   : > { %v324_v21 = vpop.f32.mrf.mxu1 }
 0x1af   : > { %328 = vst [vmem:[%s165_s28] sm:$0xff] %v324_v21 }
 0x1b0   : > { %v450_v22 = vpop.f32.mrf.mxu1 }
 0x1b1 PF: > { %s13_s12 = sadd.s32 1, %s467_s12  }
 0x1b2   : > { %p10_p4 = scmp.ge.s32.totalorder %s13_s12, 8  }
 0x1b4   :  { %12 = sbr.rel (!%p10_p4) target bundleno = 1 (0x1), region = 62 }

// kernel: trocr_loss_forward.5
= control target key start
LH: loop header
LB: loop body
LE: loop exit
PB: predicated region body
PF: predicated region fallthrough
CT: control target
= control target key end

     0   :  { %7 = vsyncpa [#allocation4], 0  ;;  %s875_s9 = smov 0   ;;  %s1427_s0 = inlined_call_operand.vmem [shape: f32[128,512], index: 0, kind: input, shape index: {}]   ;;  %s1428_s1 = inlined_call_operand.vmem [shape: s32[128,1], index: 1, kind: input, shape index: {}]   ;;  %s1429_s2 = inlined_call_operand.hbm [shape: f32[1,1], index: 2, kind: output, shape index: {}]  }
   0x1 LB: > { %s881_s10 = sadd.s32 4294967295, %s854_s9   ;;  %p699_p0 = scmp.ge.s32.totalorder %s854_s9, 1  ;;  %s854_s9 = sphi %s875_s9, %s13_s9  }
   0x2   : > { %p121_p1 = scmp.lt.s32.totalorder %s854_s9, 3 }
   0x4   : > { %p122_p2 = pnand %p699_p0, %p121_p1 }
   0x6   : > { %125 = sbr.rel (%p122_p2) target bundleno = 663 (0x297), region = 28 }
   0xb   : > { %s700_s11 = sshll.u32 %s881_s10, 3  ;;  %v856_v0 = vmov 0   ;;  %p735_p4 = scmp.eq.s32.totalorder %s881_s10, 0 }
   0xc   : > { %p145_p3 = scmp.lt.s32.totalorder %s700_s11, 15  ;;  %751 = vset.pattern.permute.xlu1 %v856_v0  ;;  %750 = vset.pattern.permute.xlu0 %v856_v0  ;;  %s858_s20 = smov 0.0  }
   0xd   : > { %729 = sst [smem:[#allocation2]] (%p735_p4), %s858_s20  ;;  %p715_p5 = scmp.ne.s32.totalorder %s881_s10, 1 }
   0xe   : > { %s1446_s11 = smov (!%p145_p3, %s700_s11), 15  ;;  %730 = sst [smem:[#allocation2 + $0x1]] (%p735_p4), %s858_s20 }
   0xf   : > { %s721_s12 = sshll.u32 %s1446_s11, 5  ;;  %s704_s16 = sshll.u32 %s1446_s11, 3 }
  0x10   : > { %s892_s15 = scalar_lea.vmem %s1427_s0, %s721_s12  ;;  %s155_s19 = scalar_lea.vmem %s1428_s1, %s704_s16 }
  0x11   : > { %v895_v1 = vld [vmem:[%s892_s15 + $0x40] sm:$0xff]  ;;  %v898_v2 = vld [vmem:[%s892_s15 + $0x48] sm:$0xff]  ;;  %v901_v3 = vld [vmem:[%s892_s15 + $0x50] sm:$0xff]  ;;  %s570_s21 = sld [smem:[#allocation2]] }
  0x12   : > { %v215_v4 = vmax.f32 %v895_v1, %v898_v2  ;;  %v906_v5 = vld [vmem:[%s892_s15] sm:$0xff]  ;;  %v909_v6 = vld [vmem:[%s892_s15 + $0x8] sm:$0xff]  ;;  %v912_v7 = vld [vmem:[%s892_s15 + $0x58] sm:$0xff]  ;;  %s714_s22 = sld [smem:[#allocation2 + $0x1]] }
  0x13   : > { %v915_v8 = vld [vmem:[%s892_s15 + $0x10] sm:$0xff]  ;;  %v205_v9 = vmax.f32 %v906_v5, %v909_v6  ;;  %v920_v10 = vld [vmem:[%s892_s15 + $0x60] sm:$0xff]  ;;  %v924_v12 = vld [vmem:[%s892_s15 + $0x18] sm:$0xff] }
  0x14   : > { %v216_v11 = vmax.f32 %v215_v4, %v901_v3  ;;  %v927_v13 = vld [vmem:[%s892_s15 + $0x68] sm:$0xff]  ;;  %v930_v14 = vld [vmem:[%s892_s15 + $0x70] sm:$0xff]  ;;  %v936_v17 = vld [vmem:[%s892_s15 + $0x20] sm:$0xff] }
  0x15   : > { %v206_v15 = vmax.f32 %v205_v9, %v915_v8  ;;  %v220_v16 = vmax.f32 %v920_v10, %v927_v13  ;;  %v939_v18 = vld [vmem:[%s892_s15 + $0x28] sm:$0xff]  ;;  %v942_v19 = vld [vmem:[%s892_s15 + $0x30] sm:$0xff]  ;;  %v946_v21 = vld [vmem:[%s892_s15 + $0x78] sm:$0xff] }
  0x16   : > { %v217_v20 = vmax.f32 %v216_v11, %v912_v7  ;;  %v210_v22 = vmax.f32 %v936_v17, %v939_v18  ;;  %v951_v23 = vld [vmem:[%s892_s15 + $0xa0] sm:$0xff]  ;;  %v954_v24 = vld [vmem:[%s892_s15 + $0xa8] sm:$0xff]  ;;  %v959_v27 = vld [vmem:[%s892_s15 + $0x38] sm:$0xff] }
  0x17   : > { %v207_v25 = vmax.f32 %v206_v15, %v924_v12  ;;  %v221_v26 = vmax.f32 %v220_v16, %v930_v14  ;;  %v962_v28 = vld [vmem:[%s892_s15 + $0xb0] sm:$0xff]  ;;  %v230_v29 = vmax.f32 %v951_v23, %v954_v24  ;;  %v967_v30 = vld [vmem:[%s892_s15 + $0x80] sm:$0xff]  ;;  %v971_v32 = vld [vmem:[%s892_s15 + $0xb8] sm:$0xff] }
  0x18   : > { %218 = vmax.xlane.f32.xlu1 %v217_v20  ;;  %v211_v31 = vmax.f32 %v210_v22, %v942_v19  ;;  %v974_v33 = vld [vmem:[%s892_s15 + $0x88] sm:$0xff]  ;;  %v977_v34 = vld [vmem:[%s892_s15 + $0x90] sm:$0xff]  ;;  %v984_v38 = vld [vmem:[%s892_s15 + $0xe0] sm:$0xff] }
  0x19   : > { %208 = vmax.xlane.f32.xlu0 %v207_v25  ;;  %v222_v35 = vmax.f32 %v221_v26, %v946_v21  ;;  %v231_v36 = vmax.f32 %v230_v29, %v962_v28  ;;  %v225_v37 = vmax.f32 %v967_v30, %v974_v33  ;;  %v987_v39 = vld [vmem:[%s892_s15 + $0xe8] sm:$0xff]  ;;  %v990_v40 = vld [vmem:[%s892_s15 + $0xf0] sm:$0xff]  ;;  %v994_v42 = vld [vmem:[%s892_s15 + $0x98] sm:$0xff] }
  0x1a   : > { %v212_v41 = vmax.f32 %v211_v31, %v959_v27  ;;  %v240_v43 = vmax.f32 %v984_v38, %v987_v39  ;;  %v999_v44 = vld [vmem:[%s892_s15 + $0xc0] sm:$0xff]  ;;  %v1002_v45 = vld [vmem:[%s892_s15 + $0xc8] sm:$0xff]  ;;  %v1006_v47 = vld [vmem:[%s892_s15 + $0xd0] sm:$0xff] }
  0x1b   : > { %v226_v46 = vmax.f32 %v225_v37, %v977_v34  ;;  %v235_v48 = vmax.f32 %v999_v44, %v1002_v45  ;;  %v232_v49 = vmax.f32 %v231_v36, %v971_v32  ;;  %v1014_v52 = vld [vmem:[%s892_s15 + $0xf8] sm:$0xff]  ;;  %v1026_v57 = vld [vmem:[%s155_s19 + $0x8] sm:$0xff]  ;;  %v1029_v58 = vld [vmem:[%s155_s19 + $0x10] sm:$0xff] }
  0x1c   : > { %223 = vmax.xlane.f32.xlu1 %v222_v35  ;;  %v241_v50 = vmax.f32 %v240_v43, %v990_v40  ;;  %v1018_v54 = vld [vmem:[%s892_s15 + $0xd8] sm:$0xff]  ;;  %v1031_v59 = vld [vmem:[%s155_s19] sm:$0xff]  ;;  %v1041_v62 = vld [vmem:[%s155_s19 + $0x28] sm:$0xff] }
  0x1d   : > { %213 = vmax.xlane.f32.xlu0 %v212_v41  ;;  %v227_v51 = vmax.f32 %v226_v46, %v994_v42  ;;  %v236_v53 = vmax.f32 %v235_v48, %v1006_v47  ;;  %v1034_v60 = vld [vmem:[%s155_s19 + $0x18] sm:$0xff]  ;;  %v1038_v61 = vld [vmem:[%s155_s19 + $0x20] sm:$0xff]  ;;  %1437 = vst [vmem:[#allocation8_spill] sm:$0xff] %v1041_v62  ;;  %v1044_v63 = vld [vmem:[%s155_s19 + $0x30] sm:$0xff] }
  0x1e   : > { %v242_v55 = vmax.f32 %v241_v50, %v1014_v52  ;;  %1435 = vst [vmem:[#allocation6_spill] sm:$0xff] %v1034_v60  ;;  %1436 = vst [vmem:[#allocation7_spill] sm:$0xff] %v1038_v61  ;;  %v1047_v0 = vld [vmem:[%s155_s19 + $0x38] sm:$0xff] }
  0x1f   : > { %v237_v56 = vmax.f32 %v236_v53, %v1018_v54  ;;  %1438 = vst [vmem:[#allocation9_spill] sm:$0xff] %v1044_v63  ;;  %1439 = vst [vmem:[#allocation10_spill] sm:$0xff] %v1047_v0 }
  0x20   : > { %233 = vmax.xlane.f32.xlu1 %v232_v49 }
  0x21   : > { %228 = vmax.xlane.f32.xlu0 %v227_v51 }
  0x24   : > { %243 = vmax.xlane.f32.xlu1 %v242_v55 }
  0x25   : > { %238 = vmax.xlane.f32.xlu0 %v237_v56 }
  0x35   : > { %390 = vperm.xlu1 %751, %v1026_v57  }
  0x39   : > { %393 = vperm.xlu1 %751, %v1029_v58  }
  0x3b   : > { %387 = vperm.xlu0 %750, %v1031_v59  }
  0x3d   : > { %396 = vperm.xlu1 %751, %v1034_v60  }
  0x41   : > { %399 = vperm.xlu1 %751, %v1038_v61  }
  0x45   : > { %402 = vperm.xlu1 %751, %v1041_v62  }
  0x49   : > { %405 = vperm.xlu1 %751, %v1044_v63  }
  0x4d   : > { %408 = vperm.xlu1 %751, %v1047_v0  }
  0xa1   : > { %v219_v4 = vpop.xlane.xlu1 %218 }
  0xa2   : > { %v1051_v9 = vsub.f32 %v895_v1, %v219_v4  ;;  %v1054_v11 = vsub.f32 %v898_v2, %v219_v4  ;;  %v1057_v15 = vsub.f32 %v901_v3, %v219_v4  ;;  %v1060_v16 = vsub.f32 %v912_v7, %v219_v4  ;;  %v209_v20 = vpop.xlane.xlu0 %208 }
  0xa3   : > { %v1063_v22 = vsub.f32 %v906_v5, %v209_v20  ;;  %v1066_v25 = vsub.f32 %v909_v6, %v209_v20  ;;  %v1072_v29 = vsub.f32 %v915_v8, %v209_v20  ;;  %v1076_v7 = vsub.f32 %v924_v12, %v209_v20 }
  0xa4   : > { %v293_v26 = vmul.f32 1.442695, %v1051_v9  ;;  %v295_v1 = vmul.f32 1.442695, %v1054_v11  ;;  %v297_v2 = vmul.f32 1.442695, %v1057_v15 }
  0xa5   : > { %v299_v3 = vmul.f32 1.442695, %v1060_v16  ;;  %v224_v31 = vpop.xlane.xlu1 %223  ;;  %v277_v5 = vmul.f32 1.442695, %v1063_v22  ;;  %v279_v35 = vmul.f32 1.442695, %v1066_v25 }
  0xa6   : > { %752 = vpow2.f32 %v293_v26  ;;  %v1080_v6 = vsub.f32 %v920_v10, %v224_v31  ;;  %v1084_v36 = vsub.f32 %v927_v13, %v224_v31  ;;  %v214_v8 = vpop.xlane.xlu0 %213  ;;  %v281_v37 = vmul.f32 1.442695, %v1072_v29 }
  0xa7   : > { %754 = vpow2.f32 %v295_v1  ;;  %v1088_v12 = vsub.f32 %v930_v14, %v224_v31  ;;  %v283_v41 = vmul.f32 1.442695, %v1076_v7  ;;  %v1092_v43 = vsub.f32 %v946_v21, %v224_v31 }
  0xa8   : > { %756 = vpow2.f32 %v297_v2  ;;  %v301_v46 = vmul.f32 1.442695, %v1080_v6  ;;  %v1096_v13 = vsub.f32 %v936_v17, %v214_v8  ;;  %v303_v48 = vmul.f32 1.442695, %v1084_v36 }
  0xa9   : > { %758 = vpow2.f32 %v299_v3  ;;  %v234_v10 = vpop.xlane.xlu1 %233  ;;  %v1100_v49 = vsub.f32 %v939_v18, %v214_v8  ;;  %v305_v14 = vmul.f32 1.442695, %v1088_v12  ;;  %v1104_v50 = vsub.f32 %v942_v19, %v214_v8 }
  0xaa   : > { %760 = vpow2.f32 %v277_v5  ;;  %v307_v21 = vmul.f32 1.442695, %v1092_v43  ;;  %v1108_v51 = vsub.f32 %v959_v27, %v214_v8  ;;  %v285_v53 = vmul.f32 1.442695, %v1096_v13  ;;  %v229_v19 = vpop.xlane.xlu0 %228 }
  0xab   : > { %762 = vpow2.f32 %v279_v35  ;;  %v1112_v55 = vsub.f32 %v951_v23, %v234_v10  ;;  %v287_v18 = vmul.f32 1.442695, %v1100_v49  ;;  %v1116_v56 = vsub.f32 %v954_v24, %v234_v10 }
  0xac   : > { %764 = vpow2.f32 %v281_v37  ;;  %v289_v4 = vmul.f32 1.442695, %v1104_v50  ;;  %v1120_v27 = vsub.f32 %v962_v28, %v234_v10  ;;  %v291_v20 = vmul.f32 1.442695, %v1108_v51 }
  0xad   : > { %766 = vpow2.f32 %v283_v41  ;;  %v244_v17 = vpop.xlane.xlu1 %243  ;;  %v1124_v26 = vsub.f32 %v971_v32, %v234_v10  ;;  %v317_v1 = vmul.f32 1.442695, %v1112_v55  ;;  %v1130_v24 = vsub.f32 %v967_v30, %v229_v19 }
  0xae   : > { %768 = vpow2.f32 %v301_v46  ;;  %v319_v28 = vmul.f32 1.442695, %v1116_v56  ;;  %v1136_v3 = vsub.f32 %v974_v33, %v229_v19  ;;  %v321_v32 = vmul.f32 1.442695, %v1120_v27 }
  0xaf   : > { %770 = vpow2.f32 %v303_v48  ;;  %v1142_v5 = vsub.f32 %v977_v34, %v229_v19  ;;  %v381_v35 = vlaneseq  ;;  %v323_v30 = vmul.f32 1.442695, %v1124_v26 }
  0xb0   : > { %772 = vpow2.f32 %v305_v14  ;;  %v1148_v37 = vsub.f32 %v994_v42, %v229_v19  ;;  %v309_v10 = vmul.f32 1.442695, %v1130_v24  ;;  %v1156_v46 = vsub.f32 %v984_v38, %v244_v17 }
  0xb1   : > { %774 = vpow2.f32 %v307_v21  ;;  %v1126_v23 = vpop.permute.xlu1 %390  ;;  %v1159_v34 = vsub.f32 %v987_v39, %v244_v17  ;;  %v311_v14 = vmul.f32 1.442695, %v1136_v3  ;;  %v239_v21 = vpop.xlane.xlu0 %238  ;;  %v1166_v19 = vand.u32 127, %v381_v35 }
  0xb2   : > { %776 = vpow2.f32 %v285_v53  ;;  %v313_v53 = vmul.f32 1.442695, %v1142_v5  ;;  %v315_v38 = vmul.f32 1.442695, %v1148_v37  ;;  %v1170_v39 = vsub.f32 %v1014_v52, %v244_v17 }
  0xb3   : > { %v1132_v2 = vpop.eup %752  ;;  %778 = vpow2.f32 %v287_v18  ;;  %v1164_v18 = vsub.f32 %v990_v40, %v244_v17  ;;  %v335_v0 = vmul.f32 1.442695, %v1159_v34  ;;  %v1177_v40 = vsub.f32 %v999_v44, %v239_v21 }
  0xb4   : > { %v1138_v31 = vpop.eup %754  ;;  %780 = vpow2.f32 %v289_v4  ;;  %v1183_v52 = vsub.f32 %v1006_v47, %v239_v21  ;;  %vm414_vm0 = vcmp.eq.s32.totalorder %v1166_v19, %v1126_v23 }
  0xb5   : > { %v1144_v8 = vpop.eup %756  ;;  %782 = vpow2.f32 %v291_v20  ;;  %v1150_v41 = vpop.permute.xlu1 %393  ;;  %v325_v47 = vmul.f32 1.442695, %v1177_v40 }
  0xb6   : > { %v1152_v33 = vpop.eup %758  ;;  %784 = vpow2.f32 %v317_v1  ;;  %vm418_vm3 = vcmp.eq.s32.totalorder %v1166_v19, %v1150_v41 }
  0xb7   : > { %v761_v48 = vpop.eup %760  ;;  %786 = vpow2.f32 %v319_v28 }
  0xb8   : > { %v763_v42 = vpop.eup %762  ;;  %788 = vpow2.f32 %v321_v32  ;;  %v333_v32 = vmul.f32 1.442695, %v1156_v46 }
  0xb9   : > { %v765_v4 = vpop.eup %764  ;;  %790 = vpow2.f32 %v323_v30  ;;  %v1172_v20 = vpop.permute.xlu1 %396  ;;  %v341_v1 = vadd.f32 %v763_v42, %v761_v48  ;;  %v1180_v30 = vsub.f32 %v1002_v45, %v239_v21  ;;  %v1187_v48 = vsub.f32 %v1018_v54, %v239_v21 }
  0xba   : > { %v767_v28 = vpop.eup %766  ;;  %792 = vpow2.f32 %v309_v10  ;;  %v337_v10 = vmul.f32 1.442695, %v1164_v18  ;;  %v1190_v42 = vadd.s32 128, %v1166_v19  ;;  %v329_v21 = vmul.f32 1.442695, %v1183_v52 }
  0xbb   : > { %v769_v35 = vpop.eup %768  ;;  %794 = vpow2.f32 %v311_v14  ;;  %v342_v17 = vadd.f32 %v765_v4, %v341_v1  ;;  %v339_v14 = vmul.f32 1.442695, %v1170_v39  ;;  %v327_v54 = vmul.f32 1.442695, %v1180_v30 }
  0xbc   : > { %v771_v63 = vpop.eup %770  ;;  %796 = vpow2.f32 %v313_v53  ;;  %vm415_vm1 = vcmp.eq.s32.totalorder %v1190_v42, %v1126_v23  ;;  %vm419_vm4 = vcmp.eq.s32.totalorder %v1190_v42, %v1150_v41  ;;  %vm422_vm5 = vcmp.eq.s32.totalorder %v1166_v19, %v1172_v20 }
  0xbd   : > { %v773_v44 = vpop.eup %772  ;;  %798 = vpow2.f32 %v315_v38  ;;  %v343_v45 = vadd.f32 %v767_v28, %v342_v17  ;;  %v356_v62 = vadd.f32 %v771_v63, %v769_v35  ;;  %v1194_v4 = vpop.permute.xlu1 %399  ;;  %v331_v38 = vmul.f32 1.442695, %v1187_v48 }
  0xbe   : > { %v775_v61 = vpop.eup %774  ;;  %800 = vpow2.f32 %v333_v32  ;;  %v351_v32 = vadd.f32 %v1138_v31, %v1132_v2  ;;  %vm423_vm6 = vcmp.eq.s32.totalorder %v1190_v42, %v1172_v20  ;;  %vm426_vm13 = vcmp.eq.s32.totalorder %v1166_v19, %v1194_v4 }
  0xbf   : > { %v777_v53 = vpop.eup %776  ;;  %802 = vpow2.f32 %v335_v0  ;;  %344 = vadd.xlane.f32.xlu1 %v343_v45  ;;  %v357_v1 = vadd.f32 %v773_v44, %v356_v62  ;;  %vm427_vm14 = vcmp.eq.s32.totalorder %v1190_v42, %v1194_v4 }
  0xc0   : > { %v779_v60 = vpop.eup %778  ;;  %804 = vpow2.f32 %v337_v10  ;;  %v1206_v10 = vadd.s32 256, %v1166_v19 }
  0xc1   : > { %v781_v63 = vpop.eup %780  ;;  %806 = vpow2.f32 %v339_v14  ;;  %v358_v28 = vadd.f32 %v775_v61, %v357_v1  ;;  %v346_v0 = vadd.f32 %v779_v60, %v777_v53  ;;  %v1208_v45 = vpop.permute.xlu1 %402  ;;  %v446_v60 = vsel %vm414_vm0, %v1096_v13, 0.0 }
  0xc2   : > { %v783_v35 = vpop.eup %782  ;;  %808 = vpow2.f32 %v325_v47  ;;  %v447_v61 = vsel %vm415_vm1, %v1100_v49, 0.0  ;;  %v352_v47 = vadd.f32 %v1144_v8, %v351_v32  ;;  %v1222_v1 = vpop.permute.xlu0 %387  ;;  %vm416_vm2 = vcmp.eq.s32.totalorder %v1206_v10, %v1126_v23 }
  0xc3   : > { %v785_v62 = vpop.eup %784  ;;  %810 = vpow2.f32 %v327_v54  ;;  %359 = vadd.xlane.f32.xlu1 %v358_v28  ;;  %v347_v17 = vadd.f32 %v781_v63, %v346_v0  ;;  %v1220_v54 = vadd.s32 384, %v1166_v19  ;;  %v479_v63 = vadd.f32 %v447_v61, %v446_v60 }
  0xc4   : > { %v787_v44 = vpop.eup %786  ;;  %812 = vpow2.f32 %v329_v21  ;;  %v353_v28 = vadd.f32 %v1152_v33, %v352_v47  ;;  %vm410_vm7 = vcmp.eq.s32.totalorder %v1166_v19, %v1222_v1  ;;  %vm411_vm8 = vcmp.eq.s32.totalorder %v1190_v42, %v1222_v1 }
  0xc5   : > { %v789_v2 = vpop.eup %788  ;;  %814 = vpow2.f32 %v331_v38  ;;  %v348_v31 = vadd.f32 %v783_v35, %v347_v17  ;;  %v366_v14 = vadd.f32 %v787_v44, %v785_v62  ;;  %v1239_v35 = vpop.permute.xlu1 %405  ;;  %vm417_vm9 = vcmp.eq.s32.totalorder %v1220_v54, %v1126_v23 }
  0xc6   : > { %v791_v53 = vpop.eup %790  ;;  %v448_v62 = vsel %vm416_vm2, %v1104_v50, 0.0  ;;  %vm424_vm10 = vcmp.eq.s32.totalorder %v1206_v10, %v1172_v20  ;;  %vm430_vm11 = vcmp.eq.s32.totalorder %v1166_v19, %v1208_v45  ;;  %vm431_vm12 = vcmp.eq.s32.totalorder %v1190_v42, %v1208_v45 }
  0xc7   : > { %v793_v21 = vpop.eup %792  ;;  %349 = vadd.xlane.f32.xlu0 %v348_v31  ;;  %v367_v13 = vadd.f32 %v789_v2, %v366_v14  ;;  %v480_v44 = vadd.f32 %v479_v63, %v448_v62  ;;  %v454_v50 = vsel %vm422_vm5, %v1080_v6, 0.0  ;;  %v455_v61 = vsel %vm423_vm6, %v1084_v36, 0.0 }
  0xc8   : > { %v795_v49 = vpop.eup %794  ;;  %v442_v47 = vsel %vm410_vm7, %v1063_v22, 0.0  ;;  %v449_v6 = vsel %vm417_vm9, %v1108_v51, 0.0  ;;  %vm425_vm15 = vcmp.eq.s32.totalorder %v1220_v54, %v1172_v20  ;;  %vm412_vm0 = vcmp.eq.s32.totalorder %v1206_v10, %v1222_v1 }
  0xc9   : > { %v797_v8 = vpop.eup %796  ;;  %v368_v38 = vadd.f32 %v791_v53, %v367_v13  ;;  %v361_v0 = vadd.f32 %v795_v49, %v793_v21  ;;  %v443_v53 = vsel %vm411_vm8, %v1066_v25, 0.0  ;;  %v481_v13 = vadd.f32 %v480_v44, %v449_v6  ;;  %v1285_v49 = vpop.permute.xlu1 %408 }
  0xca   : > { %v799_v32 = vpop.eup %798  ;;  %v456_v25 = vsel %vm424_vm10, %v1088_v12, 0.0  ;;  %v489_v23 = vadd.f32 %v455_v61, %v454_v50  ;;  %v474_v51 = vadd.f32 %v443_v53, %v442_v47  ;;  %v451_v62 = vsel %vm419_vm4, %v1054_v11, 0.0 }
  0xcb   : > { %v801_v17 = vpop.eup %800  ;;  %369 = vadd.xlane.f32.xlu1 %v368_v38  ;;  %354 = vadd.xlane.f32.xlu0 %v353_v28  ;;  %v362_v33 = vadd.f32 %v797_v8, %v361_v0  ;;  %v462_v8 = vsel %vm430_vm11, %v1112_v55, 0.0  ;;  %v463_v38 = vsel %vm431_vm12, %v1116_v56, 0.0  ;;  %v457_v55 = vsel %vm425_vm15, %v1092_v43, 0.0 }
  0xcc   : > { %v803_v60 = vpop.eup %802  ;;  %vm413_vm1 = vcmp.eq.s32.totalorder %v1220_v54, %v1222_v1  ;;  %v444_v56 = vsel %vm412_vm0, %v1072_v29, 0.0  ;;  %vm432_vm2 = vcmp.eq.s32.totalorder %v1206_v10, %v1208_v45  ;;  %vm439_vm4 = vcmp.eq.s32.totalorder %v1190_v42, %v1285_v49 }
  0xcd   : > { %v805_v2 = vpop.eup %804  ;;  %v376_v31 = vadd.f32 %v803_v60, %v801_v17  ;;  %v363_v14 = vadd.f32 %v799_v32, %v362_v33  ;;  %v450_v32 = vsel %vm418_vm3, %v1051_v9, 0.0  ;;  %vm438_vm3 = vcmp.eq.s32.totalorder %v1166_v19, %v1285_v49 }
  0xce   : > { %v807_v21 = vpop.eup %806  ;;  %v499_v11 = vadd.f32 %v463_v38, %v462_v8  ;;  %v490_v33 = vadd.f32 %v489_v23, %v456_v25  ;;  %v475_v20 = vadd.f32 %v474_v51, %v444_v56  ;;  %vm420_vm5 = vcmp.eq.s32.totalorder %v1206_v10, %v1150_v41 }
  0xcf   : > { %v809_v22 = vpop.eup %808  ;;  %v377_v36 = vadd.f32 %v805_v2, %v376_v31  ;;  %364 = vadd.xlane.f32.xlu0 %v363_v14  ;;  %v484_v43 = vadd.f32 %v451_v62, %v450_v32  ;;  %vm434_vm6 = vcmp.eq.s32.totalorder %v1166_v19, %v1239_v35  ;;  %vm435_vm7 = vcmp.eq.s32.totalorder %v1190_v42, %v1239_v35 }
  0xd0   : > { %v811_v63 = vpop.eup %810  ;;  %v464_v44 = vsel %vm432_vm2, %v1120_v27, 0.0  ;;  %v470_v60 = vsel %vm438_vm3, %v1156_v46, 0.0  ;;  %v471_v50 = vsel %vm439_vm4, %v1159_v34, 0.0  ;;  %v458_v61 = vsel %vm426_vm13, %v1130_v24, 0.0 }
  0xd1   : > { %v813_v28 = vpop.eup %812  ;;  %v378_v12 = vadd.f32 %v807_v21, %v377_v36  ;;  %v371_v0 = vadd.f32 %v811_v63, %v809_v22  ;;  %v459_v2 = vsel %vm427_vm14, %v1136_v3, 0.0  ;;  %v445_v27 = vsel %vm413_vm1, %v1076_v7, 0.0  ;;  %v1442_v63 = vld [vmem:[#allocation8_spill] sm:$0xff] }
  0xd2   : > { %v815_v17 = vpop.eup %814  ;;  %vm433_vm8 = vcmp.eq.s32.totalorder %v1220_v54, %v1208_v45  ;;  %v500_v46 = vadd.f32 %v499_v11, %v464_v44  ;;  %v452_v34 = vsel %vm420_vm5, %v1057_v15, 0.0  ;;  %v491_v31 = vadd.f32 %v490_v33, %v457_v55 }
  0xd3   : > { %379 = vadd.xlane.f32.xlu1 %v378_v12  ;;  %v372_v9 = vadd.f32 %v813_v28, %v371_v0  ;;  %v476_v24 = vadd.f32 %v475_v20, %v445_v27  ;;  %vm421_vm9 = vcmp.eq.s32.totalorder %v1220_v54, %v1150_v41  ;;  %v485_v14 = vadd.f32 %v484_v43, %v452_v34  ;;  %v1444_v12 = vld [vmem:[#allocation10_spill] sm:$0xff] }
  0xd4   : > { %vm440_vm10 = vcmp.eq.s32.totalorder %v1206_v10, %v1285_v49  ;;  %v509_v3 = vadd.f32 %v471_v50, %v470_v60  ;;  %vm428_vm11 = vcmp.eq.s32.totalorder %v1206_v10, %v1194_v4  ;;  %v494_v7 = vadd.f32 %v459_v2, %v458_v61 }
  0xd5   : > { %v373_v29 = vadd.f32 %v815_v17, %v372_v9  ;;  %v465_v1 = vsel %vm433_vm8, %v1124_v26, 0.0  ;;  %v466_v15 = vsel %vm434_vm6, %v1177_v40, 0.0  ;;  %v467_v41 = vsel %vm435_vm7, %v1180_v30, 0.0 }
  0xd6   : > { %v501_v45 = vadd.f32 %v500_v46, %v465_v1  ;;  %v453_v47 = vsel %vm421_vm9, %v1060_v16, 0.0  ;;  %vm441_vm12 = vcmp.eq.s32.totalorder %v1220_v54, %v1285_v49  ;;  %v472_v26 = vsel %vm440_vm10, %v1164_v18, 0.0 }
  0xd7   : > { %482 = vadd.xlane.f32.xlu1 %v481_v13  ;;  %374 = vadd.xlane.f32.xlu0 %v373_v29  ;;  %v486_v53 = vadd.f32 %v485_v14, %v453_v47  ;;  %vm429_vm13 = vcmp.eq.s32.totalorder %v1220_v54, %v1194_v4  ;;  %v460_v19 = vsel %vm428_vm11, %v1142_v5, 0.0  ;;  %v510_v40 = vadd.f32 %v509_v3, %v472_v26 }
  0xd8   : > { %v495_v21 = vadd.f32 %v494_v7, %v460_v19  ;;  %vm436_vm14 = vcmp.eq.s32.totalorder %v1206_v10, %v1239_v35  ;;  %v504_v30 = vadd.f32 %v467_v41, %v466_v15  ;;  %v473_v16 = vsel %vm441_vm12, %v1170_v39, 0.0 }
  0xd9   : > { %v461_v42 = vsel %vm429_vm13, %v1148_v37, 0.0  ;;  %v468_v6 = vsel %vm436_vm14, %v1183_v52, 0.0  ;;  %v511_v18 = vadd.f32 %v510_v40, %v473_v16  ;;  %vm437_vm15 = vcmp.eq.s32.totalorder %v1220_v54, %v1239_v35  ;;  %v1440_v52 = vld [vmem:[#allocation6_spill] sm:$0xff]  ;;  %v1441_v35 = vld [vmem:[#allocation7_spill] sm:$0xff] }
  0xda   : > { %v496_v22 = vadd.f32 %v495_v21, %v461_v42  ;;  %v505_v5 = vadd.f32 %v504_v30, %v468_v6  ;;  %vm515_vm0 = vcmp.ge.s32.totalorder %v1026_v57, 0  ;;  %v469_v4 = vsel %vm437_vm15, %v1187_v48, 0.0 }
  0xdb   : > { %492 = vadd.xlane.f32.xlu1 %v491_v31  ;;  %477 = vadd.xlane.f32.xlu0 %v476_v24  ;;  %v857_v36 = vmov 0.0   ;;  %vm571_vm1 = vcmask 7168   ;;  %vm514_vm2 = vcmp.ge.s32.totalorder %v1031_v59, 0  ;;  %vm516_vm3 = vcmp.ge.s32.totalorder %v1029_v58, 0  ;;  %v1443_v58 = vld [vmem:[#allocation9_spill] sm:$0xff] }
  0xdc   : > { %v506_v10 = vadd.f32 %v505_v5, %v469_v4  ;;  %v707_v13 = vsel %vm515_vm0, 1.0, %v857_v36  ;;  %v706_v39 = vsel %vm514_vm2, 1.0, %v857_v36  ;;  %vm517_vm4 = vcmp.ge.s32.totalorder %v1440_v52, 0 }
  0xdd   : > { %v601_v37 = vsel %vm571_vm1, %v707_v13, 0.0  ;;  %v600_v57 = vsel %vm571_vm1, %v706_v39, 0.0  ;;  %vm518_vm5 = vcmp.ge.s32.totalorder %v1441_v35, 0  ;;  %v1377_v48 = vsel %vm517_vm4, 1.0, %v857_v36 }
  0xde   : > { %v602_v54 = vadd.f32 %v601_v37, %v600_v57  ;;  %v1379_v25 = vsel %vm516_vm3, 1.0, %v857_v36  ;;  %vm519_vm6 = vcmp.ge.s32.totalorder %v1442_v63, 0  ;;  %v605_v59 = vsel %vm571_vm1, %v1377_v48, 0.0 }
  0xdf   : > { %502 = vadd.xlane.f32.xlu1 %v501_v45  ;;  %487 = vadd.xlane.f32.xlu0 %v486_v53  ;;  %v603_v49 = vsel %vm571_vm1, %v1379_v25, 0.0  ;;  %vm520_vm7 = vcmp.ge.s32.totalorder %v1443_v58, 0  ;;  %v1387_v51 = vsel %vm518_vm5, 1.0, %v857_v36  ;;  %v1391_v38 = vsel %vm519_vm6, 1.0, %v857_v36 }
  0xe0   : > { %v604_v23 = vadd.f32 %v603_v49, %v602_v54  ;;  %v607_v8 = vsel %vm571_vm1, %v1387_v51, 0.0  ;;  %vm521_vm8 = vcmp.ge.s32.totalorder %v1444_v12, 0  ;;  %v609_v0 = vsel %vm571_vm1, %v1391_v38, 0.0 }
  0xe1   : > { %v1396_v32 = vsel %vm520_vm7, 1.0, %v857_v36  ;;  %v1400_v55 = vsel %vm521_vm8, 1.0, %v857_v36 }
  0xe2   : > { %v606_v28 = vadd.f32 %v605_v59, %v604_v23  ;;  %v611_v17 = vsel %vm571_vm1, %v1396_v32, 0.0  ;;  %v613_v9 = vsel %vm571_vm1, %v1400_v55, 0.0 }
  0xe3   : > { %512 = vadd.xlane.f32.xlu1 %v511_v18  ;;  %497 = vadd.xlane.f32.xlu0 %v496_v22 }
  0xe4   : > { %v608_v62 = vadd.f32 %v607_v8, %v606_v28 }
  0xe6   : > { %v610_v56 = vadd.f32 %v609_v0, %v608_v62 }
  0xe7   : > { %507 = vadd.xlane.f32.xlu0 %v506_v10 }
  0xe8   : > { %v612_v11 = vadd.f32 %v611_v17, %v610_v56 }
  0xea   : > { %v614_v33 = vadd.f32 %v613_v9, %v612_v11 }
  0xec   : > { %615 = vadd.xlane.f32.xlu1 %v614_v33 }
 0x148   : > { %v345_v20 = vpop.xlane.xlu1 %344 }
 0x14c   : > { %v360_v43 = vpop.xlane.xlu1 %359 }
 0x150   : > { %v350_v29 = vpop.xlane.xlu0 %349 }
 0x151   : > { %816 = vlog2.f32 %v350_v29 }
 0x152   : > { %818 = vlog2.f32 %v360_v43 }
 0x153   : > { %820 = vlog2.f32 %v345_v20 }
 0x154   : > { %v370_v44 = vpop.xlane.xlu1 %369  ;;  %v355_v60 = vpop.xlane.xlu0 %354 }
 0x155   : > { %822 = vlog2.f32 %v355_v60 }
 0x156   : > { %824 = vlog2.f32 %v370_v44 }
 0x158   : > { %v365_v50 = vpop.xlane.xlu0 %364 }
 0x159   : > { %826 = vlog2.f32 %v365_v50 }
 0x15c   : > { %v380_v61 = vpop.xlane.xlu1 %379 }
 0x15d   : > { %828 = vlog2.f32 %v380_v61 }
 0x15e   : > { %v817_v2 = vpop.eup %816 }
 0x15f   : > { %v819_v27 = vpop.eup %818  ;;  %v541_v46 = vmul.f32 0.6931472, %v817_v2 }
 0x160   : > { %v821_v34 = vpop.eup %820  ;;  %v483_v31 = vpop.xlane.xlu1 %482  ;;  %v545_v3 = vmul.f32 0.6931472, %v819_v27 }
 0x161   : > { %v375_v24 = vpop.xlane.xlu0 %374  ;;  %v555_v14 = vsub.f32 %v541_v46, %v483_v31  ;;  %v539_v1 = vmul.f32 0.6931472, %v821_v34 }
 0x162   : > { %830 = vlog2.f32 %v375_v24  ;;  %v823_v7 = vpop.eup %822 }
 0x163   : > { %v825_v15 = vpop.eup %824  ;;  %v563_v47 = vmul.f32 %v707_v13, %v555_v14  ;;  %v543_v26 = vmul.f32 0.6931472, %v823_v7 }
 0x164   : > { %v493_v41 = vpop.xlane.xlu1 %492  ;;  %v549_v30 = vmul.f32 0.6931472, %v825_v15 }
 0x165   : > { %v478_v45 = vpop.xlane.xlu0 %477  ;;  %v557_v40 = vsub.f32 %v545_v3, %v493_v41  ;;  %v573_v6 = vsel %vm571_vm1, %v563_v47, 0.0 }
 0x166   : > { %v554_v53 = vsub.f32 %v539_v1, %v478_v45  ;;  %v827_v19 = vpop.eup %826 }
 0x167   : > { %v547_v5 = vmul.f32 0.6931472, %v827_v19  ;;  %v565_v10 = vmul.f32 %v1377_v48, %v557_v40 }
 0x168   : > { %v562_v21 = vmul.f32 %v706_v39, %v554_v53  ;;  %v503_v16 = vpop.xlane.xlu1 %502 }
 0x169   : > { %v488_v42 = vpop.xlane.xlu0 %487  ;;  %v559_v36 = vsub.f32 %v549_v30, %v503_v16  ;;  %v577_v59 = vsel %vm571_vm1, %v565_v10, 0.0 }
 0x16a   : > { %v572_v18 = vsel %vm571_vm1, %v562_v21, 0.0  ;;  %v556_v22 = vsub.f32 %v543_v26, %v488_v42  ;;  %v829_v4 = vpop.eup %828 }
 0x16b   : > { %v553_v37 = vmul.f32 0.6931472, %v829_v4  ;;  %v574_v52 = vadd.f32 %v573_v6, %v572_v18  ;;  %v567_v58 = vmul.f32 %v1391_v38, %v559_v36 }
 0x16c   : > { %v564_v13 = vmul.f32 %v1379_v25, %v556_v22  ;;  %v513_v57 = vpop.xlane.xlu1 %512 }
 0x16d   : > { %v498_v54 = vpop.xlane.xlu0 %497  ;;  %v561_v23 = vsub.f32 %v553_v37, %v513_v57  ;;  %v581_v17 = vsel %vm571_vm1, %v567_v58, 0.0 }
 0x16e   : > { %v575_v39 = vsel %vm571_vm1, %v564_v13, 0.0  ;;  %v558_v35 = vsub.f32 %v547_v5, %v498_v54 }
 0x16f   : > { %v831_v63 = vpop.eup %830  ;;  %v576_v49 = vadd.f32 %v575_v39, %v574_v52  ;;  %v569_v56 = vmul.f32 %v1400_v55, %v561_v23 }
 0x170   : > { %v566_v8 = vmul.f32 %v1387_v51, %v558_v35  ;;  %v551_v48 = vmul.f32 0.6931472, %v831_v63 }
 0x171   : > { %v578_v28 = vadd.f32 %v577_v59, %v576_v49  ;;  %v508_v25 = vpop.xlane.xlu0 %507  ;;  %v585_v51 = vsel %vm571_vm1, %v569_v56, 0.0 }
 0x172   : > { %v579_v12 = vsel %vm571_vm1, %v566_v8, 0.0  ;;  %v560_v0 = vsub.f32 %v551_v48, %v508_v25 }
 0x173   : > { %v580_v62 = vadd.f32 %v579_v12, %v578_v28 }
 0x174   : > { %v568_v9 = vmul.f32 %v1396_v32, %v560_v0 }
 0x175   : > { %v582_v11 = vadd.f32 %v581_v17, %v580_v62  ;;  %v616_v43 = vpop.xlane.xlu1 %615 }
 0x176   : > { %v583_v38 = vsel %vm571_vm1, %v568_v9, 0.0  ;;  %v617_v29 = vrot.slane %v616_v43, 4 }
 0x177   : > { %v584_v33 = vadd.f32 %v583_v38, %v582_v11 }
 0x178   : > { %v618_v44 = vadd.f32 %v617_v29, %v616_v43 }
 0x179   : > { %v586_v20 = vadd.f32 %v585_v51, %v584_v33 }
 0x17a   : > { %v619_v60 = vrot.slane %v618_v44, 2 }
 0x17b   : > { %587 = vadd.xlane.f32.xlu0 %v586_v20 }
 0x17c   : > { %v620_v32 = vadd.f32 %v619_v60, %v618_v44 }
 0x17e   : > { %v621_v46 = vrot.slane %v620_v32, 1 }
 0x180   : > { %v622_v24 = vadd.f32 %v621_v46, %v620_v32 }
 0x204   : > { %v588_v50 = vpop.xlane.xlu0 %587 }
 0x205   : > { %v589_v55 = vrot.slane %v588_v50, 4 }
 0x207   : > { %v590_v61 = vadd.f32 %v589_v55, %v588_v50 }
 0x209   : > { %v591_v2 = vrot.slane %v590_v61, 2 }
 0x20b   : > { %v592_v27 = vadd.f32 %v591_v2, %v590_v61 }
 0x20d   : > { %v593_v34 = vrot.slane %v592_v27, 1 }
 0x20f   : > { %v594_v31 = vadd.f32 %v593_v34, %v592_v27 }
 0x211   : > { %722 = vpush %v594_v31 }
 0x212   : > { %724 = vpush %v622_v24 }
 0x242   : > { %s723_s23 = spop %722  ;;  %630 = sbr.rel (%p715_p5) target bundleno = 657 (0x291), region = 36 }
 0x243   : > { %s596_s24 = sadd.f32 %s723_s23, %s570_s21  ;;  %s725_s25 = spop %724 }
 0x244   : > { %s624_s26 = sadd.f32 %s725_s25, %s714_s22 }
 0x245   : > { %598 = sst [smem:[#allocation2]] %s596_s24 }
 0x246   : > { %626 = sst [smem:[#allocation2 + $0x1]] %s624_s26 }
 0x247   : > { %s716_s27 = sld [smem:[#allocation2 + $0x1]] }
 0x248   : > { %s631_s28 = sld [smem:[#allocation2]] }
 0x24d   : > { %v633_v14 = vstv %s716_s27 }
 0x24e   : > { %832 = vrcp.f32 %v633_v14 }
 0x25b   : > { %v833_v3 = vpop.eup %832 }
 0x25c   : > { %726 = vpush %v833_v3 }
 0x28d   : > { %s727_s29 = spop %726 }
 0x28e   : > { %s636_s30 = smul.f32 %s727_s29, %s631_s28 }
 0x290   : > { %638 = sst [smem:[#allocation3]] %s636_s30 }
 0x291 PF: > { %p736_p6 = scmp.eq.s32.totalorder %s881_s10, 1  ;;  %s859_s3 = smov [#allocation3]  }
 0x293   : > { %732 = dma.smem_to_hbm (%p736_p6), %s859_s3, 16, %s1429_s2, [#allocation4]  }
 0x294   : > { %849 = dma.done.wait (%p736_p6), [#allocation4], 16  }
 0x295   : > { %851 = vsyncadd (%p736_p6), [#allocation4], 4294967280 }
 0x296   : > { %652 = sfence }
 0x297 PF: > { %s13_s9 = sadd.s32 1, %s854_s9  }
 0x298   : > { %p10_p7 = scmp.ge.s32.totalorder %s13_s9, 4  }
 0x29a   :  { %12 = sbr.rel (!%p10_p7) target bundleno = 1 (0x1), region = 71 }
 0x29f   :  { %658 = vsyncpa [#allocation4], 1 }
 0x2a0   :  { %660 = vsyncpa [#allocation4 + $0x1], 1 }

</bundles_post_ra>
